<compile_context>
chip_gen: v6e
topology: v6e:2x2x1
jax: 0.10.0
libtpu: 0.0.40
codegen_flags: <defaults>
</compile_context>

<pallas_src>
import jax
import jax.numpy as jnp
from jax import lax
from jax.experimental import pallas as pl
from jax.experimental.pallas import tpu as pltpu


OUT_PAD = 128  # lane-dense padded width of the dense head output


def lstm_kernel(xp_ref, whh_ref, wd_ref, bd_ref, out_ref):
    """Refs (per batch tile):
       xp_ref : (T, Bt, 4H) f32   pre-projected inputs (bias folded, g-cols x2)
       whh_ref: (H, 4H)     bf16  recurrent weights (g-cols x2)
       wd_ref : (H, 128)    bf16  dense head, zero-padded to 128 lanes
       bd_ref : (1, 128)    f32
       out_ref: (Bt, 128)   f32
    """
    T, Bt, G = xp_ref.shape
    H = G // 4
    whh = whh_ref[...]                      # resident across the whole tile

    def step(t, carry):
        h, c = carry
        # Serial path: one small bf16 MXU matmul + gate VPU/EUP math.
        gates = xp_ref[t] + jnp.dot(h.astype(jnp.bfloat16), whh,
                                    preferred_element_type=jnp.float32)
        sig = jax.nn.sigmoid(gates)         # single full-width EUP pass
        i_g = sig[:, 0 * H:1 * H]
        f_g = sig[:, 1 * H:2 * H]
        g_g = 2.0 * sig[:, 2 * H:3 * H] - 1.0   # tanh(z) = 2*sigmoid(2z) - 1
        o_g = sig[:, 3 * H:4 * H]
        c_new = f_g * c + i_g * g_g
        tanh_c = 2.0 * jax.nn.sigmoid(2.0 * c_new) - 1.0
        h_new = o_g * tanh_c
        return h_new, c_new

    h0 = jnp.zeros((Bt, H), jnp.float32)
    c0 = jnp.zeros((Bt, H), jnp.float32)
    h, _ = lax.fori_loop(0, T, step, (h0, c0), unroll=True)

    # TODO(synk): Dropout(p=0.2) is identity in eval mode; training-mode
    # random mask intentionally not implemented.
    h_relu = jnp.maximum(h, 0.0)
    dense = jnp.dot(h_relu.astype(jnp.bfloat16), wd_ref[...],
                    preferred_element_type=jnp.float32) + bd_ref[...]
    out_ref[...] = jnp.maximum(dense, 0.0)  # lane-dense (Bt, 128) store


def lstm_ohlc_forward(x, params, *, batch_tile=1024):
    """x: (B, T, 4) float32.  Returns (B, 4) float32."""
    x = x.astype(jnp.float32)
    B, T, F = x.shape
    H = params["W_hh"].shape[1]
    G = 4 * H

    # ---- parameter prep (plain XLA, negligible) ----
    wih_T = params["W_ih"].T.astype(jnp.float32)                 # (F, 4H)
    whh_T = params["W_hh"].T.astype(jnp.float32)                 # (H, 4H)
    b = (params["b_ih"] + params["b_hh"]).astype(jnp.float32)    # (4H,)

    # tanh fold: scale only the g-gate block (cols 2H:3H, order i,f,g,o) by 2.
    gate_scale = jnp.concatenate([
        jnp.ones((2 * H,), jnp.float32),
        jnp.full((H,), 2.0, jnp.float32),
        jnp.ones((H,), jnp.float32),
    ])
    wih_T = wih_T * gate_scale[None, :]
    whh_T = whh_T * gate_scale[None, :]
    b = b * gate_scale

    # Hoisted input projection: one (B*T, F) @ (F, 4H) GEMM in XLA producing a
    # lane-dense (T, B, 4H) array the kernel streams with dense DMAs.
    xp = jnp.dot(x.reshape(B * T, F), wih_T,
                 preferred_element_type=jnp.float32) + b[None, :]
    xp = xp.reshape(B, T, G).transpose(1, 0, 2)                  # (T, B, 4H)

    whh_bf16 = whh_T.astype(jnp.bfloat16)                        # (H, 4H)

    # Dense head zero-padded to 128 lane-dense output columns.
    wd = jnp.zeros((H, OUT_PAD), jnp.float32)
    wd = wd.at[:, :4].set(params["W_dense"].T.astype(jnp.float32))
    wd_bf16 = wd.astype(jnp.bfloat16)
    bd = jnp.zeros((1, OUT_PAD), jnp.float32)
    bd = bd.at[0, :4].set(params["b_dense"].astype(jnp.float32))

    # ---- batch tiling: sublane-multiple tiles; >= 2 grid steps when B > 8 so
    # both v7x TensorCores get work; pad batch to a tile multiple. ----
    if B <= 8:
        bt = B
    else:
        half = ((-(-B // 2)) + 7) // 8 * 8       # round_up(ceil(B/2), 8)
        bt = min(batch_tile, half)
    Bp = ((B + bt - 1) // bt) * bt
    if Bp != B:
        xp = jnp.pad(xp, ((0, 0), (0, Bp - B), (0, 0)))
    grid = (Bp // bt,)

    out = pl.pallas_call(
        lstm_kernel,
        out_shape=jax.ShapeDtypeStruct((Bp, OUT_PAD), jnp.float32),
        grid=grid,
        in_specs=[
            pl.BlockSpec((T, bt, G), lambda i: (0, i, 0)),    # X_proj streamed
            pl.BlockSpec((H, G), lambda i: (0, 0)),           # weights resident
            pl.BlockSpec((H, OUT_PAD), lambda i: (0, 0)),
            pl.BlockSpec((1, OUT_PAD), lambda i: (0, 0)),
        ],
        out_specs=pl.BlockSpec((bt, OUT_PAD), lambda i: (i, 0)),
        compiler_params=pltpu.CompilerParams(
            dimension_semantics=("parallel",),                # megacore sharding
            vmem_limit_bytes=48 * 1024 * 1024,
        ),
    )(xp, whh_bf16, wd_bf16, bd)
    return out[:B, :4]


def init_params(key, cell_count=32, input_size=4, out_size=4):
    """Deterministic PyTorch-style init: uniform(-1/sqrt(H), 1/sqrt(H))."""
    H = cell_count
    bound = 1.0 / jnp.sqrt(jnp.float32(H))
    ks = jax.random.split(key, 6)
    u = lambda k, shape: jax.random.uniform(
        k, shape, jnp.float32, minval=-bound, maxval=bound)
    return {
        "W_ih": u(ks[0], (4 * H, input_size)),   # PyTorch weight_ih_l0
        "W_hh": u(ks[1], (4 * H, H)),            # PyTorch weight_hh_l0
        "b_ih": u(ks[2], (4 * H,)),
        "b_hh": u(ks[3], (4 * H,)),
        "W_dense": u(ks[4], (out_size, H)),      # PyTorch Linear.weight
        "b_dense": u(ks[5], (out_size,)),
    }


if __name__ == "__main__":
    key = jax.random.PRNGKey(0)
    k_x, k_p = jax.random.split(key)

    B, T, F, H = 2, 8, 4, 32
    x = jax.random.normal(k_x, (B, T, F), jnp.float32)
    params = init_params(k_p, cell_count=H, input_size=F, out_size=4)

    out = lstm_ohlc_forward(x, params)
    out = jax.block_until_ready(out)

    assert out.shape == (B, 4) and out.dtype == jnp.float32
    assert bool(jnp.all(jnp.isfinite(out)))
    assert bool(jnp.all(out >= 0.0))   # final ReLU
    print("KERNEL_OK")
</pallas_src>

<mosaic_0001>
module attributes {stable_mosaic.version = 11 : i64} {
  func.func @lstm_kernel(%arg0: i32, %arg1: memref<8x2x128xf32, #tpu.memory_space<vmem>>, %arg2: memref<32x128xbf16, #tpu.memory_space<vmem>>, %arg3: memref<32x128xbf16, #tpu.memory_space<vmem>>, %arg4: memref<1x128xf32, #tpu.memory_space<vmem>>, %arg5: memref<2x128xf32, #tpu.memory_space<vmem>>) attributes {dimension_semantics = [#tpu.dimension_semantics<parallel>], iteration_bounds = array<i64: 1>, scalar_prefetch = 0 : i64, scratch_operands = 0 : i64, tpu.core_type = #tpu.core_type<tc>, window_params = [{transform_indices = @transform_0, window_bounds = array<i64: 8, 2, 128>}, {pipeline_mode = #tpu.pipeline_mode<synchronous>, transform_indices = @transform_1, window_bounds = array<i64: 32, 128>}, {pipeline_mode = #tpu.pipeline_mode<synchronous>, transform_indices = @transform_2, window_bounds = array<i64: 32, 128>}, {pipeline_mode = #tpu.pipeline_mode<synchronous>, transform_indices = @transform_3, window_bounds = array<i64: 1, 128>}, {transform_indices = @transform_4, window_bounds = array<i64: 2, 128>}]} {
    %c0 = arith.constant 0 : index
    %c0_0 = arith.constant 0 : index
    %0 = vector.load %arg2[%c0, %c0_0] : memref<32x128xbf16, #tpu.memory_space<vmem>>, vector<32x128xbf16>
    %cst = arith.constant 0.000000e+00 : f32
    %1 = vector.broadcast %cst : f32 to vector<2x32xf32>
    %cst_1 = arith.constant 0.000000e+00 : f32
    %2 = vector.broadcast %cst_1 : f32 to vector<2x32xf32>
    %c0_i32 = arith.constant 0 : i32
    %3 = arith.index_cast %c0_i32 : i32 to index
    %c0_2 = arith.constant 0 : index
    %c0_3 = arith.constant 0 : index
    %4 = vector.load %arg1[%3, %c0_2, %c0_3] : memref<8x2x128xf32, #tpu.memory_space<vmem>>, vector<1x2x128xf32>
    %5 = vector.shape_cast %4 : vector<1x2x128xf32> to vector<2x128xf32>
    %6 = arith.truncf %1 : vector<2x32xf32> to vector<2x32xbf16>
    %cst_4 = arith.constant dense<0.000000e+00> : vector<2x128xf32>
    %7 = tpu.matmul %6, %0, %cst_4 {dimension_numbers = #tpu.dot_dimension_numbers<[1], [0], [0], [1], [0, 0, 1, 1], [], []>} : vector<2x32xbf16>, vector<32x128xbf16>, vector<2x128xf32> -> vector<2x128xf32>
    %8 = arith.addf %5, %7 : vector<2x128xf32>
    %9 = arith.negf %8 : vector<2x128xf32>
    %10 = math.exp %9 : vector<2x128xf32>
    %cst_5 = arith.constant 1.000000e+00 : f32
    %11 = vector.broadcast %cst_5 : f32 to vector<2x128xf32>
    %12 = arith.addf %11, %10 : vector<2x128xf32>
    %13 = arith.divf %11, %12 : vector<2x128xf32>
    %14 = vector.extract_strided_slice %13 {offsets = [0, 0], sizes = [2, 32], strides = [1, 1]} : vector<2x128xf32> to vector<2x32xf32>
    %15 = vector.extract_strided_slice %13 {offsets = [0, 32], sizes = [2, 32], strides = [1, 1]} : vector<2x128xf32> to vector<2x32xf32>
    %16 = vector.extract_strided_slice %13 {offsets = [0, 64], sizes = [2, 32], strides = [1, 1]} : vector<2x128xf32> to vector<2x32xf32>
    %cst_6 = arith.constant 2.000000e+00 : f32
    %17 = vector.broadcast %cst_6 : f32 to vector<2x32xf32>
    %18 = arith.mulf %17, %16 : vector<2x32xf32>
    %cst_7 = arith.constant 1.000000e+00 : f32
    %19 = vector.broadcast %cst_7 : f32 to vector<2x32xf32>
    %20 = arith.subf %18, %19 : vector<2x32xf32>
    %21 = vector.extract_strided_slice %13 {offsets = [0, 96], sizes = [2, 32], strides = [1, 1]} : vector<2x128xf32> to vector<2x32xf32>
    %22 = arith.mulf %15, %2 : vector<2x32xf32>
    %23 = arith.mulf %14, %20 : vector<2x32xf32>
    %24 = arith.addf %22, %23 : vector<2x32xf32>
    %cst_8 = arith.constant 2.000000e+00 : f32
    %25 = vector.broadcast %cst_8 : f32 to vector<2x32xf32>
    %26 = arith.mulf %25, %24 : vector<2x32xf32>
    %27 = arith.negf %26 : vector<2x32xf32>
    %28 = math.exp %27 : vector<2x32xf32>
    %cst_9 = arith.constant 1.000000e+00 : f32
    %29 = vector.broadcast %cst_9 : f32 to vector<2x32xf32>
    %30 = arith.addf %29, %28 : vector<2x32xf32>
    %31 = arith.divf %29, %30 : vector<2x32xf32>
    %cst_10 = arith.constant 2.000000e+00 : f32
    %32 = vector.broadcast %cst_10 : f32 to vector<2x32xf32>
    %33 = arith.mulf %32, %31 : vector<2x32xf32>
    %cst_11 = arith.constant 1.000000e+00 : f32
    %34 = vector.broadcast %cst_11 : f32 to vector<2x32xf32>
    %35 = arith.subf %33, %34 : vector<2x32xf32>
    %36 = arith.mulf %21, %35 : vector<2x32xf32>
    %c1_i32 = arith.constant 1 : i32
    %37 = arith.index_cast %c1_i32 : i32 to index
    %c0_12 = arith.constant 0 : index
    %c0_13 = arith.constant 0 : index
    %38 = vector.load %arg1[%37, %c0_12, %c0_13] : memref<8x2x128xf32, #tpu.memory_space<vmem>>, vector<1x2x128xf32>
    %39 = vector.shape_cast %38 : vector<1x2x128xf32> to vector<2x128xf32>
    %40 = arith.truncf %36 : vector<2x32xf32> to vector<2x32xbf16>
    %cst_14 = arith.constant dense<0.000000e+00> : vector<2x128xf32>
    %41 = tpu.matmul %40, %0, %cst_14 {dimension_numbers = #tpu.dot_dimension_numbers<[1], [0], [0], [1], [0, 0, 1, 1], [], []>} : vector<2x32xbf16>, vector<32x128xbf16>, vector<2x128xf32> -> vector<2x128xf32>
    %42 = arith.addf %39, %41 : vector<2x128xf32>
    %43 = arith.negf %42 : vector<2x128xf32>
    %44 = math.exp %43 : vector<2x128xf32>
    %cst_15 = arith.constant 1.000000e+00 : f32
    %45 = vector.broadcast %cst_15 : f32 to vector<2x128xf32>
    %46 = arith.addf %45, %44 : vector<2x128xf32>
    %47 = arith.divf %45, %46 : vector<2x128xf32>
    %48 = vector.extract_strided_slice %47 {offsets = [0, 0], sizes = [2, 32], strides = [1, 1]} : vector<2x128xf32> to vector<2x32xf32>
    %49 = vector.extract_strided_slice %47 {offsets = [0, 32], sizes = [2, 32], strides = [1, 1]} : vector<2x128xf32> to vector<2x32xf32>
    %50 = vector.extract_strided_slice %47 {offsets = [0, 64], sizes = [2, 32], strides = [1, 1]} : vector<2x128xf32> to vector<2x32xf32>
    %cst_16 = arith.constant 2.000000e+00 : f32
    %51 = vector.broadcast %cst_16 : f32 to vector<2x32xf32>
    %52 = arith.mulf %51, %50 : vector<2x32xf32>
    %cst_17 = arith.constant 1.000000e+00 : f32
    %53 = vector.broadcast %cst_17 : f32 to vector<2x32xf32>
    %54 = arith.subf %52, %53 : vector<2x32xf32>
    %55 = vector.extract_strided_slice %47 {offsets = [0, 96], sizes = [2, 32], strides = [1, 1]} : vector<2x128xf32> to vector<2x32xf32>
    %56 = arith.mulf %49, %24 : vector<2x32xf32>
    %57 = arith.mulf %48, %54 : vector<2x32xf32>
    %58 = arith.addf %56, %57 : vector<2x32xf32>
    %cst_18 = arith.constant 2.000000e+00 : f32
    %59 = vector.broadcast %cst_18 : f32 to vector<2x32xf32>
    %60 = arith.mulf %59, %58 : vector<2x32xf32>
    %61 = arith.negf %60 : vector<2x32xf32>
    %62 = math.exp %61 : vector<2x32xf32>
    %cst_19 = arith.constant 1.000000e+00 : f32
    %63 = vector.broadcast %cst_19 : f32 to vector<2x32xf32>
    %64 = arith.addf %63, %62 : vector<2x32xf32>
    %65 = arith.divf %63, %64 : vector<2x32xf32>
    %cst_20 = arith.constant 2.000000e+00 : f32
    %66 = vector.broadcast %cst_20 : f32 to vector<2x32xf32>
    %67 = arith.mulf %66, %65 : vector<2x32xf32>
    %cst_21 = arith.constant 1.000000e+00 : f32
    %68 = vector.broadcast %cst_21 : f32 to vector<2x32xf32>
    %69 = arith.subf %67, %68 : vector<2x32xf32>
    %70 = arith.mulf %55, %69 : vector<2x32xf32>
    %c2_i32 = arith.constant 2 : i32
    %71 = arith.index_cast %c2_i32 : i32 to index
    %c0_22 = arith.constant 0 : index
    %c0_23 = arith.constant 0 : index
    %72 = vector.load %arg1[%71, %c0_22, %c0_23] : memref<8x2x128xf32, #tpu.memory_space<vmem>>, vector<1x2x128xf32>
    %73 = vector.shape_cast %72 : vector<1x2x128xf32> to vector<2x128xf32>
    %74 = arith.truncf %70 : vector<2x32xf32> to vector<2x32xbf16>
    %cst_24 = arith.constant dense<0.000000e+00> : vector<2x128xf32>
    %75 = tpu.matmul %74, %0, %cst_24 {dimension_numbers = #tpu.dot_dimension_numbers<[1], [0], [0], [1], [0, 0, 1, 1], [], []>} : vector<2x32xbf16>, vector<32x128xbf16>, vector<2x128xf32> -> vector<2x128xf32>
    %76 = arith.addf %73, %75 : vector<2x128xf32>
    %77 = arith.negf %76 : vector<2x128xf32>
    %78 = math.exp %77 : vector<2x128xf32>
    %cst_25 = arith.constant 1.000000e+00 : f32
    %79 = vector.broadcast %cst_25 : f32 to vector<2x128xf32>
    %80 = arith.addf %79, %78 : vector<2x128xf32>
    %81 = arith.divf %79, %80 : vector<2x128xf32>
    %82 = vector.extract_strided_slice %81 {offsets = [0, 0], sizes = [2, 32], strides = [1, 1]} : vector<2x128xf32> to vector<2x32xf32>
    %83 = vector.extract_strided_slice %81 {offsets = [0, 32], sizes = [2, 32], strides = [1, 1]} : vector<2x128xf32> to vector<2x32xf32>
    %84 = vector.extract_strided_slice %81 {offsets = [0, 64], sizes = [2, 32], strides = [1, 1]} : vector<2x128xf32> to vector<2x32xf32>
    %cst_26 = arith.constant 2.000000e+00 : f32
    %85 = vector.broadcast %cst_26 : f32 to vector<2x32xf32>
    %86 = arith.mulf %85, %84 : vector<2x32xf32>
    %cst_27 = arith.constant 1.000000e+00 : f32
    %87 = vector.broadcast %cst_27 : f32 to vector<2x32xf32>
    %88 = arith.subf %86, %87 : vector<2x32xf32>
    %89 = vector.extract_strided_slice %81 {offsets = [0, 96], sizes = [2, 32], strides = [1, 1]} : vector<2x128xf32> to vector<2x32xf32>
    %90 = arith.mulf %83, %58 : vector<2x32xf32>
    %91 = arith.mulf %82, %88 : vector<2x32xf32>
    %92 = arith.addf %90, %91 : vector<2x32xf32>
    %cst_28 = arith.constant 2.000000e+00 : f32
    %93 = vector.broadcast %cst_28 : f32 to vector<2x32xf32>
    %94 = arith.mulf %93, %92 : vector<2x32xf32>
    %95 = arith.negf %94 : vector<2x32xf32>
    %96 = math.exp %95 : vector<2x32xf32>
    %cst_29 = arith.constant 1.000000e+00 : f32
    %97 = vector.broadcast %cst_29 : f32 to vector<2x32xf32>
    %98 = arith.addf %97, %96 : vector<2x32xf32>
    %99 = arith.divf %97, %98 : vector<2x32xf32>
    %cst_30 = arith.constant 2.000000e+00 : f32
    %100 = vector.broadcast %cst_30 : f32 to vector<2x32xf32>
    %101 = arith.mulf %100, %99 : vector<2x32xf32>
    %cst_31 = arith.constant 1.000000e+00 : f32
    %102 = vector.broadcast %cst_31 : f32 to vector<2x32xf32>
    %103 = arith.subf %101, %102 : vector<2x32xf32>
    %104 = arith.mulf %89, %103 : vector<2x32xf32>
    %c3_i32 = arith.constant 3 : i32
    %105 = arith.index_cast %c3_i32 : i32 to index
    %c0_32 = arith.constant 0 : index
    %c0_33 = arith.constant 0 : index
    %106 = vector.load %arg1[%105, %c0_32, %c0_33] : memref<8x2x128xf32, #tpu.memory_space<vmem>>, vector<1x2x128xf32>
    %107 = vector.shape_cast %106 : vector<1x2x128xf32> to vector<2x128xf32>
    %108 = arith.truncf %104 : vector<2x32xf32> to vector<2x32xbf16>
    %cst_34 = arith.constant dense<0.000000e+00> : vector<2x128xf32>
    %109 = tpu.matmul %108, %0, %cst_34 {dimension_numbers = #tpu.dot_dimension_numbers<[1], [0], [0], [1], [0, 0, 1, 1], [], []>} : vector<2x32xbf16>, vector<32x128xbf16>, vector<2x128xf32> -> vector<2x128xf32>
    %110 = arith.addf %107, %109 : vector<2x128xf32>
    %111 = arith.negf %110 : vector<2x128xf32>
    %112 = math.exp %111 : vector<2x128xf32>
    %cst_35 = arith.constant 1.000000e+00 : f32
    %113 = vector.broadcast %cst_35 : f32 to vector<2x128xf32>
    %114 = arith.addf %113, %112 : vector<2x128xf32>
    %115 = arith.divf %113, %114 : vector<2x128xf32>
    %116 = vector.extract_strided_slice %115 {offsets = [0, 0], sizes = [2, 32], strides = [1, 1]} : vector<2x128xf32> to vector<2x32xf32>
    %117 = vector.extract_strided_slice %115 {offsets = [0, 32], sizes = [2, 32], strides = [1, 1]} : vector<2x128xf32> to vector<2x32xf32>
    %118 = vector.extract_strided_slice %115 {offsets = [0, 64], sizes = [2, 32], strides = [1, 1]} : vector<2x128xf32> to vector<2x32xf32>
    %cst_36 = arith.constant 2.000000e+00 : f32
    %119 = vector.broadcast %cst_36 : f32 to vector<2x32xf32>
    %120 = arith.mulf %119, %118 : vector<2x32xf32>
    %cst_37 = arith.constant 1.000000e+00 : f32
    %121 = vector.broadcast %cst_37 : f32 to vector<2x32xf32>
    %122 = arith.subf %120, %121 : vector<2x32xf32>
    %123 = vector.extract_strided_slice %115 {offsets = [0, 96], sizes = [2, 32], strides = [1, 1]} : vector<2x128xf32> to vector<2x32xf32>
    %124 = arith.mulf %117, %92 : vector<2x32xf32>
    %125 = arith.mulf %116, %122 : vector<2x32xf32>
    %126 = arith.addf %124, %125 : vector<2x32xf32>
    %cst_38 = arith.constant 2.000000e+00 : f32
    %127 = vector.broadcast %cst_38 : f32 to vector<2x32xf32>
    %128 = arith.mulf %127, %126 : vector<2x32xf32>
    %129 = arith.negf %128 : vector<2x32xf32>
    %130 = math.exp %129 : vector<2x32xf32>
    %cst_39 = arith.constant 1.000000e+00 : f32
    %131 = vector.broadcast %cst_39 : f32 to vector<2x32xf32>
    %132 = arith.addf %131, %130 : vector<2x32xf32>
    %133 = arith.divf %131, %132 : vector<2x32xf32>
    %cst_40 = arith.constant 2.000000e+00 : f32
    %134 = vector.broadcast %cst_40 : f32 to vector<2x32xf32>
    %135 = arith.mulf %134, %133 : vector<2x32xf32>
    %cst_41 = arith.constant 1.000000e+00 : f32
    %136 = vector.broadcast %cst_41 : f32 to vector<2x32xf32>
    %137 = arith.subf %135, %136 : vector<2x32xf32>
    %138 = arith.mulf %123, %137 : vector<2x32xf32>
    %c4_i32 = arith.constant 4 : i32
    %139 = arith.index_cast %c4_i32 : i32 to index
    %c0_42 = arith.constant 0 : index
    %c0_43 = arith.constant 0 : index
    %140 = vector.load %arg1[%139, %c0_42, %c0_43] : memref<8x2x128xf32, #tpu.memory_space<vmem>>, vector<1x2x128xf32>
    %141 = vector.shape_cast %140 : vector<1x2x128xf32> to vector<2x128xf32>
    %142 = arith.truncf %138 : vector<2x32xf32> to vector<2x32xbf16>
    %cst_44 = arith.constant dense<0.000000e+00> : vector<2x128xf32>
    %143 = tpu.matmul %142, %0, %cst_44 {dimension_numbers = #tpu.dot_dimension_numbers<[1], [0], [0], [1], [0, 0, 1, 1], [], []>} : vector<2x32xbf16>, vector<32x128xbf16>, vector<2x128xf32> -> vector<2x128xf32>
    %144 = arith.addf %141, %143 : vector<2x128xf32>
    %145 = arith.negf %144 : vector<2x128xf32>
    %146 = math.exp %145 : vector<2x128xf32>
    %cst_45 = arith.constant 1.000000e+00 : f32
    %147 = vector.broadcast %cst_45 : f32 to vector<2x128xf32>
    %148 = arith.addf %147, %146 : vector<2x128xf32>
    %149 = arith.divf %147, %148 : vector<2x128xf32>
    %150 = vector.extract_strided_slice %149 {offsets = [0, 0], sizes = [2, 32], strides = [1, 1]} : vector<2x128xf32> to vector<2x32xf32>
    %151 = vector.extract_strided_slice %149 {offsets = [0, 32], sizes = [2, 32], strides = [1, 1]} : vector<2x128xf32> to vector<2x32xf32>
    %152 = vector.extract_strided_slice %149 {offsets = [0, 64], sizes = [2, 32], strides = [1, 1]} : vector<2x128xf32> to vector<2x32xf32>
    %cst_46 = arith.constant 2.000000e+00 : f32
    %153 = vector.broadcast %cst_46 : f32 to vector<2x32xf32>
    %154 = arith.mulf %153, %152 : vector<2x32xf32>
    %cst_47 = arith.constant 1.000000e+00 : f32
    %155 = vector.broadcast %cst_47 : f32 to vector<2x32xf32>
    %156 = arith.subf %154, %155 : vector<2x32xf32>
    %157 = vector.extract_strided_slice %149 {offsets = [0, 96], sizes = [2, 32], strides = [1, 1]} : vector<2x128xf32> to vector<2x32xf32>
    %158 = arith.mulf %151, %126 : vector<2x32xf32>
    %159 = arith.mulf %150, %156 : vector<2x32xf32>
    %160 = arith.addf %158, %159 : vector<2x32xf32>
    %cst_48 = arith.constant 2.000000e+00 : f32
    %161 = vector.broadcast %cst_48 : f32 to vector<2x32xf32>
    %162 = arith.mulf %161, %160 : vector<2x32xf32>
    %163 = arith.negf %162 : vector<2x32xf32>
    %164 = math.exp %163 : vector<2x32xf32>
    %cst_49 = arith.constant 1.000000e+00 : f32
    %165 = vector.broadcast %cst_49 : f32 to vector<2x32xf32>
    %166 = arith.addf %165, %164 : vector<2x32xf32>
    %167 = arith.divf %165, %166 : vector<2x32xf32>
    %cst_50 = arith.constant 2.000000e+00 : f32
    %168 = vector.broadcast %cst_50 : f32 to vector<2x32xf32>
    %169 = arith.mulf %168, %167 : vector<2x32xf32>
    %cst_51 = arith.constant 1.000000e+00 : f32
    %170 = vector.broadcast %cst_51 : f32 to vector<2x32xf32>
    %171 = arith.subf %169, %170 : vector<2x32xf32>
    %172 = arith.mulf %157, %171 : vector<2x32xf32>
    %c5_i32 = arith.constant 5 : i32
    %173 = arith.index_cast %c5_i32 : i32 to index
    %c0_52 = arith.constant 0 : index
    %c0_53 = arith.constant 0 : index
    %174 = vector.load %arg1[%173, %c0_52, %c0_53] : memref<8x2x128xf32, #tpu.memory_space<vmem>>, vector<1x2x128xf32>
    %175 = vector.shape_cast %174 : vector<1x2x128xf32> to vector<2x128xf32>
    %176 = arith.truncf %172 : vector<2x32xf32> to vector<2x32xbf16>
    %cst_54 = arith.constant dense<0.000000e+00> : vector<2x128xf32>
    %177 = tpu.matmul %176, %0, %cst_54 {dimension_numbers = #tpu.dot_dimension_numbers<[1], [0], [0], [1], [0, 0, 1, 1], [], []>} : vector<2x32xbf16>, vector<32x128xbf16>, vector<2x128xf32> -> vector<2x128xf32>
    %178 = arith.addf %175, %177 : vector<2x128xf32>
    %179 = arith.negf %178 : vector<2x128xf32>
    %180 = math.exp %179 : vector<2x128xf32>
    %cst_55 = arith.constant 1.000000e+00 : f32
    %181 = vector.broadcast %cst_55 : f32 to vector<2x128xf32>
    %182 = arith.addf %181, %180 : vector<2x128xf32>
    %183 = arith.divf %181, %182 : vector<2x128xf32>
    %184 = vector.extract_strided_slice %183 {offsets = [0, 0], sizes = [2, 32], strides = [1, 1]} : vector<2x128xf32> to vector<2x32xf32>
    %185 = vector.extract_strided_slice %183 {offsets = [0, 32], sizes = [2, 32], strides = [1, 1]} : vector<2x128xf32> to vector<2x32xf32>
    %186 = vector.extract_strided_slice %183 {offsets = [0, 64], sizes = [2, 32], strides = [1, 1]} : vector<2x128xf32> to vector<2x32xf32>
    %cst_56 = arith.constant 2.000000e+00 : f32
    %187 = vector.broadcast %cst_56 : f32 to vector<2x32xf32>
    %188 = arith.mulf %187, %186 : vector<2x32xf32>
    %cst_57 = arith.constant 1.000000e+00 : f32
    %189 = vector.broadcast %cst_57 : f32 to vector<2x32xf32>
    %190 = arith.subf %188, %189 : vector<2x32xf32>
    %191 = vector.extract_strided_slice %183 {offsets = [0, 96], sizes = [2, 32], strides = [1, 1]} : vector<2x128xf32> to vector<2x32xf32>
    %192 = arith.mulf %185, %160 : vector<2x32xf32>
    %193 = arith.mulf %184, %190 : vector<2x32xf32>
    %194 = arith.addf %192, %193 : vector<2x32xf32>
    %cst_58 = arith.constant 2.000000e+00 : f32
    %195 = vector.broadcast %cst_58 : f32 to vector<2x32xf32>
    %196 = arith.mulf %195, %194 : vector<2x32xf32>
    %197 = arith.negf %196 : vector<2x32xf32>
    %198 = math.exp %197 : vector<2x32xf32>
    %cst_59 = arith.constant 1.000000e+00 : f32
    %199 = vector.broadcast %cst_59 : f32 to vector<2x32xf32>
    %200 = arith.addf %199, %198 : vector<2x32xf32>
    %201 = arith.divf %199, %200 : vector<2x32xf32>
    %cst_60 = arith.constant 2.000000e+00 : f32
    %202 = vector.broadcast %cst_60 : f32 to vector<2x32xf32>
    %203 = arith.mulf %202, %201 : vector<2x32xf32>
    %cst_61 = arith.constant 1.000000e+00 : f32
    %204 = vector.broadcast %cst_61 : f32 to vector<2x32xf32>
    %205 = arith.subf %203, %204 : vector<2x32xf32>
    %206 = arith.mulf %191, %205 : vector<2x32xf32>
    %c6_i32 = arith.constant 6 : i32
    %207 = arith.index_cast %c6_i32 : i32 to index
    %c0_62 = arith.constant 0 : index
    %c0_63 = arith.constant 0 : index
    %208 = vector.load %arg1[%207, %c0_62, %c0_63] : memref<8x2x128xf32, #tpu.memory_space<vmem>>, vector<1x2x128xf32>
    %209 = vector.shape_cast %208 : vector<1x2x128xf32> to vector<2x128xf32>
    %210 = arith.truncf %206 : vector<2x32xf32> to vector<2x32xbf16>
    %cst_64 = arith.constant dense<0.000000e+00> : vector<2x128xf32>
    %211 = tpu.matmul %210, %0, %cst_64 {dimension_numbers = #tpu.dot_dimension_numbers<[1], [0], [0], [1], [0, 0, 1, 1], [], []>} : vector<2x32xbf16>, vector<32x128xbf16>, vector<2x128xf32> -> vector<2x128xf32>
    %212 = arith.addf %209, %211 : vector<2x128xf32>
    %213 = arith.negf %212 : vector<2x128xf32>
    %214 = math.exp %213 : vector<2x128xf32>
    %cst_65 = arith.constant 1.000000e+00 : f32
    %215 = vector.broadcast %cst_65 : f32 to vector<2x128xf32>
    %216 = arith.addf %215, %214 : vector<2x128xf32>
    %217 = arith.divf %215, %216 : vector<2x128xf32>
    %218 = vector.extract_strided_slice %217 {offsets = [0, 0], sizes = [2, 32], strides = [1, 1]} : vector<2x128xf32> to vector<2x32xf32>
    %219 = vector.extract_strided_slice %217 {offsets = [0, 32], sizes = [2, 32], strides = [1, 1]} : vector<2x128xf32> to vector<2x32xf32>
    %220 = vector.extract_strided_slice %217 {offsets = [0, 64], sizes = [2, 32], strides = [1, 1]} : vector<2x128xf32> to vector<2x32xf32>
    %cst_66 = arith.constant 2.000000e+00 : f32
    %221 = vector.broadcast %cst_66 : f32 to vector<2x32xf32>
    %222 = arith.mulf %221, %220 : vector<2x32xf32>
    %cst_67 = arith.constant 1.000000e+00 : f32
    %223 = vector.broadcast %cst_67 : f32 to vector<2x32xf32>
    %224 = arith.subf %222, %223 : vector<2x32xf32>
    %225 = vector.extract_strided_slice %217 {offsets = [0, 96], sizes = [2, 32], strides = [1, 1]} : vector<2x128xf32> to vector<2x32xf32>
    %226 = arith.mulf %219, %194 : vector<2x32xf32>
    %227 = arith.mulf %218, %224 : vector<2x32xf32>
    %228 = arith.addf %226, %227 : vector<2x32xf32>
    %cst_68 = arith.constant 2.000000e+00 : f32
    %229 = vector.broadcast %cst_68 : f32 to vector<2x32xf32>
    %230 = arith.mulf %229, %228 : vector<2x32xf32>
    %231 = arith.negf %230 : vector<2x32xf32>
    %232 = math.exp %231 : vector<2x32xf32>
    %cst_69 = arith.constant 1.000000e+00 : f32
    %233 = vector.broadcast %cst_69 : f32 to vector<2x32xf32>
    %234 = arith.addf %233, %232 : vector<2x32xf32>
    %235 = arith.divf %233, %234 : vector<2x32xf32>
    %cst_70 = arith.constant 2.000000e+00 : f32
    %236 = vector.broadcast %cst_70 : f32 to vector<2x32xf32>
    %237 = arith.mulf %236, %235 : vector<2x32xf32>
    %cst_71 = arith.constant 1.000000e+00 : f32
    %238 = vector.broadcast %cst_71 : f32 to vector<2x32xf32>
    %239 = arith.subf %237, %238 : vector<2x32xf32>
    %240 = arith.mulf %225, %239 : vector<2x32xf32>
    %c7_i32 = arith.constant 7 : i32
    %241 = arith.index_cast %c7_i32 : i32 to index
    %c0_72 = arith.constant 0 : index
    %c0_73 = arith.constant 0 : index
    %242 = vector.load %arg1[%241, %c0_72, %c0_73] : memref<8x2x128xf32, #tpu.memory_space<vmem>>, vector<1x2x128xf32>
    %243 = vector.shape_cast %242 : vector<1x2x128xf32> to vector<2x128xf32>
    %244 = arith.truncf %240 : vector<2x32xf32> to vector<2x32xbf16>
    %cst_74 = arith.constant dense<0.000000e+00> : vector<2x128xf32>
    %245 = tpu.matmul %244, %0, %cst_74 {dimension_numbers = #tpu.dot_dimension_numbers<[1], [0], [0], [1], [0, 0, 1, 1], [], []>} : vector<2x32xbf16>, vector<32x128xbf16>, vector<2x128xf32> -> vector<2x128xf32>
    %246 = arith.addf %243, %245 : vector<2x128xf32>
    %247 = arith.negf %246 : vector<2x128xf32>
    %248 = math.exp %247 : vector<2x128xf32>
    %cst_75 = arith.constant 1.000000e+00 : f32
    %249 = vector.broadcast %cst_75 : f32 to vector<2x128xf32>
    %250 = arith.addf %249, %248 : vector<2x128xf32>
    %251 = arith.divf %249, %250 : vector<2x128xf32>
    %252 = vector.extract_strided_slice %251 {offsets = [0, 0], sizes = [2, 32], strides = [1, 1]} : vector<2x128xf32> to vector<2x32xf32>
    %253 = vector.extract_strided_slice %251 {offsets = [0, 32], sizes = [2, 32], strides = [1, 1]} : vector<2x128xf32> to vector<2x32xf32>
    %254 = vector.extract_strided_slice %251 {offsets = [0, 64], sizes = [2, 32], strides = [1, 1]} : vector<2x128xf32> to vector<2x32xf32>
    %cst_76 = arith.constant 2.000000e+00 : f32
    %255 = vector.broadcast %cst_76 : f32 to vector<2x32xf32>
    %256 = arith.mulf %255, %254 : vector<2x32xf32>
    %cst_77 = arith.constant 1.000000e+00 : f32
    %257 = vector.broadcast %cst_77 : f32 to vector<2x32xf32>
    %258 = arith.subf %256, %257 : vector<2x32xf32>
    %259 = vector.extract_strided_slice %251 {offsets = [0, 96], sizes = [2, 32], strides = [1, 1]} : vector<2x128xf32> to vector<2x32xf32>
    %260 = arith.mulf %253, %228 : vector<2x32xf32>
    %261 = arith.mulf %252, %258 : vector<2x32xf32>
    %262 = arith.addf %260, %261 : vector<2x32xf32>
    %cst_78 = arith.constant 2.000000e+00 : f32
    %263 = vector.broadcast %cst_78 : f32 to vector<2x32xf32>
    %264 = arith.mulf %263, %262 : vector<2x32xf32>
    %265 = arith.negf %264 : vector<2x32xf32>
    %266 = math.exp %265 : vector<2x32xf32>
    %cst_79 = arith.constant 1.000000e+00 : f32
    %267 = vector.broadcast %cst_79 : f32 to vector<2x32xf32>
    %268 = arith.addf %267, %266 : vector<2x32xf32>
    %269 = arith.divf %267, %268 : vector<2x32xf32>
    %cst_80 = arith.constant 2.000000e+00 : f32
    %270 = vector.broadcast %cst_80 : f32 to vector<2x32xf32>
    %271 = arith.mulf %270, %269 : vector<2x32xf32>
    %cst_81 = arith.constant 1.000000e+00 : f32
    %272 = vector.broadcast %cst_81 : f32 to vector<2x32xf32>
    %273 = arith.subf %271, %272 : vector<2x32xf32>
    %274 = arith.mulf %259, %273 : vector<2x32xf32>
    %c8_i32 = arith.constant 8 : i32
    %cst_82 = arith.constant 0.000000e+00 : f32
    %275 = vector.broadcast %cst_82 : f32 to vector<2x32xf32>
    %276 = arith.maximumf %274, %275 : vector<2x32xf32>
    %277 = arith.truncf %276 : vector<2x32xf32> to vector<2x32xbf16>
    %c0_83 = arith.constant 0 : index
    %c0_84 = arith.constant 0 : index
    %278 = vector.load %arg3[%c0_83, %c0_84] : memref<32x128xbf16, #tpu.memory_space<vmem>>, vector<32x128xbf16>
    %cst_85 = arith.constant dense<0.000000e+00> : vector<2x128xf32>
    %279 = tpu.matmul %277, %278, %cst_85 {dimension_numbers = #tpu.dot_dimension_numbers<[1], [0], [0], [1], [0, 0, 1, 1], [], []>} : vector<2x32xbf16>, vector<32x128xbf16>, vector<2x128xf32> -> vector<2x128xf32>
    %c0_86 = arith.constant 0 : index
    %c0_87 = arith.constant 0 : index
    %280 = vector.load %arg4[%c0_86, %c0_87] : memref<1x128xf32, #tpu.memory_space<vmem>>, vector<1x128xf32>
    %281 = vector.broadcast %280 : vector<1x128xf32> to vector<2x128xf32>
    %282 = arith.addf %279, %281 : vector<2x128xf32>
    %cst_88 = arith.constant 0.000000e+00 : f32
    %283 = vector.broadcast %cst_88 : f32 to vector<2x128xf32>
    %284 = arith.maximumf %282, %283 : vector<2x128xf32>
    %c0_89 = arith.constant 0 : index
    %c0_90 = arith.constant 0 : index
    %285 = vector.load %arg5[%c0_89, %c0_90] : memref<2x128xf32, #tpu.memory_space<vmem>>, vector<2x128xf32>
    tpu.vector_store %arg5[%c0_89, %c0_90], %284 {strides = array<i32>} : memref<2x128xf32, #tpu.memory_space<vmem>>, vector<2x128xf32>,
    return
  }
  func.func @transform_0(%arg0: i32) -> (i32, i32, i32) {
    %c0_i32 = arith.constant 0 : i32
    %c0_i32_0 = arith.constant 0 : i32
    %c0_i32_1 = arith.constant 0 : i32
    return %c0_i32, %arg0, %c0_i32_0 : i32, i32, i32
  }
  func.func @transform_1(%arg0: i32) -> (i32, i32) {
    %c0_i32 = arith.constant 0 : i32
    %c0_i32_0 = arith.constant 0 : i32
    %c0_i32_1 = arith.constant 0 : i32
    return %c0_i32, %c0_i32_0 : i32, i32
  }
  func.func @transform_2(%arg0: i32) -> (i32, i32) {
    %c0_i32 = arith.constant 0 : i32
    %c0_i32_0 = arith.constant 0 : i32
    %c0_i32_1 = arith.constant 0 : i32
    return %c0_i32, %c0_i32_0 : i32, i32
  }
  func.func @transform_3(%arg0: i32) -> (i32, i32) {
    %c0_i32 = arith.constant 0 : i32
    %c0_i32_0 = arith.constant 0 : i32
    %c0_i32_1 = arith.constant 0 : i32
    return %c0_i32, %c0_i32_0 : i32, i32
  }
  func.func @transform_4(%arg0: i32) -> (i32, i32) {
    %c0_i32 = arith.constant 0 : i32
    %c0_i32_0 = arith.constant 0 : i32
    return %arg0, %c0_i32 : i32, i32
  }
}

</mosaic_0001>

<bundles_post_ra>
// kernel: tpu_custom_call.1
= control target key start
LH: loop header
LB: loop body
LE: loop exit
PB: predicated region body
PF: predicated region fallthrough
CT: control target
= control target key end

     0   :  { %9 = vsyncpa [#allocation3], 0  ;;  %s1287_s0 = inlined_call_operand.hbm [shape: f32[8,2,128], index: 0, kind: input, shape index: {}]   ;;  %s1288_s1 = inlined_call_operand.hbm [shape: bf16[32,128], index: 1, kind: input, shape index: {}]   ;;  %s1289_s2 = inlined_call_operand.hbm [shape: bf16[32,128], index: 2, kind: input, shape index: {}]   ;;  %s1290_s3 = inlined_call_operand.vmem [shape: f32[1,128], index: 3, kind: input, shape index: {}]   ;;  %s1291_s4 = inlined_call_operand.hbm [shape: f32[2,128], index: 4, kind: output, shape index: {}]  }
   0x1   :  { %10 = vsyncpa [#allocation6], 0 }
   0x2   :  { %11 = vsyncpa [#allocation4], 0  ;;  %s1134_s15 = smov [#allocation5]  }
   0x3   :  { %s29_s16 = sshll.u32 %s1134_s15, 4  ;;  %s30_s16 = int_to_ptr.vmem [resolvable:$true] %s29_s16 }
   0x4   :  { %s1056_s17 = scalar_lea.vmem %s30_s16, 256  ;;  %p1061_p1 = scmp.lt.s32.totalorder %s30_s16, %s30_s16 }
   0x5   :  { %p1057_p0 = scmp.ne.s32.totalorder %s30_s16, %s1056_s17  ;;  %p1062_p2 = scmp.lt.s32.totalorder %s1056_s17, %s1056_s17 }
   0x7   :  { %p1063_p3 = por %p1062_p2, %p1061_p1 }
   0x9   :  { %p1064_p4 = pnand %p1063_p3, %p1057_p0 }
   0xb   :  { %1067 = shalt.err (!%p1064_p4)
}
   0xc   :  { %s1135_s18 = smov 64   ;;  %s1136_s19 = smov 4  }
   0xd   :  { %35 = dma.hbm_to_vmem [thread:$0]  %s1288_s1, 256, %s30_s16, [#allocation6], %s1135_s18, %s1135_s18, %s1136_s19  }
   0xe   :  { %s1137_s22 = smov [#allocation2]  }
   0xf   :  { %s17_s23 = sshll.u32 %s1137_s22, 4  ;;  %s18_s23 = int_to_ptr.vmem [resolvable:$true] %s17_s23 }
  0x10   :  { %s1076_s24 = scalar_lea.vmem %s18_s23, 256  ;;  %p1081_p6 = scmp.lt.s32.totalorder %s18_s23, %s18_s23 }
  0x11   :  { %p1077_p5 = scmp.ne.s32.totalorder %s18_s23, %s1076_s24  ;;  %p1082_p7 = scmp.lt.s32.totalorder %s1076_s24, %s1076_s24 }
  0x13   :  { %p1083_p8 = por %p1082_p7, %p1081_p6 }
  0x15   :  { %p1084_p9 = pnand %p1083_p8, %p1077_p5 }
  0x17   :  { %1087 = shalt.err (!%p1084_p9)
}
  0x18   :  { %s1138_s25 = smov 32   ;;  %s1139_s26 = smov 2  }
  0x19   :  { %23 = dma.hbm_to_vmem [thread:$0]  %s1287_s0, 256, %s18_s23, [#allocation3], %s1138_s25, %s1138_s25, %s1139_s26  }
  0x1a   :  { %s1140_s29 = smov [#allocation7]  }
  0x1b   :  { %s41_s1 = sshll.u32 %s1140_s29, 4  ;;  %s42_s1 = int_to_ptr.vmem [resolvable:$true] %s41_s1 }
  0x1c   :  { %s1096_s30 = scalar_lea.vmem %s42_s1, 256  ;;  %p1101_p11 = scmp.lt.s32.totalorder %s42_s1, %s42_s1 }
  0x1d   :  { %p1097_p10 = scmp.ne.s32.totalorder %s42_s1, %s1096_s30  ;;  %p1102_p12 = scmp.lt.s32.totalorder %s1096_s30, %s1096_s30 }
  0x1f   :  { %p1103_p13 = por %p1102_p12, %p1101_p11 }
  0x21   :  { %p1104_p0 = pnand %p1103_p13, %p1097_p10 }
  0x23   :  { %1107 = shalt.err (!%p1104_p0)
}
  0x24   :  { %47 = dma.hbm_to_vmem [thread:$0]  %s1289_s2, 256, %s42_s1, [#allocation6], %s1135_s18, %s1135_s18, %s1136_s19  }
  0x25   :  { %1128 = dma.done.wait [#allocation3], 256  }
  0x26   :  { %1129 = vsyncadd [#allocation3], 4294967040 }
  0x27   :  { %1130 = dma.done.wait [#allocation6], 512  }
  0x28   :  { %1131 = vsyncadd [#allocation6], 4294966784  ;;  %v1141_v0 = vmov 0.0   ;;  %vm1142_vm0 = vmmov 0   ;;  %v1191_v1 = vld [vmem:[#allocation5 + $0x8] sm:$0xff]   ;;  %v1194_v2 = vld [vmem:[#allocation5] sm:$0xff]  }
  0x29   :  { %897 = vmatprep.subr.bf16.mxu0 %v1141_v0  ;;  %901 = vmatprep.mubr.msk.bf16.mxu0 %vm1142_vm0, %v1141_v0  ;;  %v1143_v3 = vmov 0   ;;  %v64_v4 = vld [vmem:[#allocation2] sm:$0x3]  ;;  %vm77_vm1 = vcmask 261120   ;;  %v156_v32 = vld [vmem:[#allocation2 + $0x2] sm:$0x3] }
  0x2a   :  { %905 = vmatprep.subr.bf16.mxu1 %v1141_v0  ;;  %909 = vmatprep.mubr.msk.bf16.mxu1 %vm1142_vm0, %v1141_v0  ;;  %v239_v60 = vld [vmem:[#allocation2 + $0x4] sm:$0x3]  ;;  %s1144_s7 = smov [#allocation8]  }
  0x2b   :  { %898 = vmatpush3.bf16.msra.mxu0 %v1191_v1  ;;  %906 = vmatpush3.bf16.msra.mxu1 %v1191_v1  ;;  %s815_s8 = sshll.u32 %s1144_s7, 4  ;;  %s816_s8 = int_to_ptr.vmem [resolvable:$true] %s815_s8 }
  0x2c   :  { %899 = vmatprep.subr.bf16.mxu0 %v1141_v0  ;;  %907 = vmatprep.subr.bf16.mxu1 %v1141_v0  ;;  %s1108_s9 = scalar_lea.vmem %s816_s8, 32  ;;  %p1113_p2 = scmp.lt.s32.totalorder %s816_s8, %s816_s8 }
  0x2d   :  { %p1109_p1 = scmp.ne.s32.totalorder %s816_s8, %s1108_s9  ;;  %p1114_p3 = scmp.lt.s32.totalorder %s1108_s9, %s1108_s9 }
  0x2f   :  { %900 = vmatpush3.bf16.msra.mxu0 %v1194_v2  ;;  %908 = vmatpush3.bf16.msra.mxu1 %v1194_v2  ;;  %p1115_p4 = por %p1114_p3, %p1113_p2 }
  0x30   :  { %913 = vmatprep.subr.bf16.mxu0 %v1141_v0  ;;  %921 = vmatprep.subr.bf16.mxu1 %v1141_v0 }
  0x31   :  { %p1116_p5 = pnand %p1115_p4, %p1109_p1 }
  0x32   :  { %902 = vmatmul.mubr.bf16.vlgmr.msra.gmra.mxu0 %v1143_v3 }
  0x33   :  { %914 = vmatpush3.bf16.msra.mxu0 %v1191_v1  ;;  %917 = vmatprep.mubr.msk.bf16.mxu0 %vm1142_vm0, %v1141_v0 }
  0x34   :  { %915 = vmatprep.subr.bf16.mxu0 %v1141_v0 }
  0x37   :  { %916 = vmatpush3.bf16.msra.mxu0 %v1194_v2 }
  0x38   :  { %929 = vmatprep.subr.bf16.mxu0 %v1141_v0 }
  0xf2   :  { %v115_v5 = vpop.f32.mrf.mxu0 }
  0xf3   :  { %v121_v6 = vadd.f32 %v115_v5, %v64_v4 }
  0xf4   :  { %v903_v7 = vpop.f32.mrf.mxu0 }
  0xf5   :  { %v827_v8 = vmul.f32 -1.442695, %v121_v6 }
  0xf6   :  { %v118_v9 = vpop.f32.mrf.mxu0 }
  0xf7   :  { %984 = vpow2.f32 %v827_v8 }
  0xf8   :  { %v904_v10 = vpop.f32.mrf.mxu0 }
 0x104   :  { %v985_v11 = vpop.eup %984 }
 0x105   :  { %v125_v12 = vadd.f32 1.0, %v985_v11 }
 0x107   :  { %986 = vrcp.f32 %v125_v12 }
 0x114   :  { %v987_v13 = vpop.eup %986 }
 0x115   :  { %v128_v14 = vmul.f32 2.0, %v987_v13  ;;  %v130_v18 = vmul.f32 0.0, %v987_v13 }
 0x117   :  { %v828_v15 = vadd.f32 -1.0, %v128_v14 }
 0x119   :  { %132 = vrot.lane.b32.xlu0 %v828_v15, %s1135_s18 }
 0x18b   :  { %v133_v16 = vpop.permute.xlu0 %132 }
 0x18c   :  { %v135_v17 = vmul.f32 %v987_v13, %v133_v16 }
 0x18e   :  { %137 = vrot.lane.b32.xlu0 %v135_v17, %s1138_s25 }
 0x200   :  { %v138_v19 = vpop.permute.xlu0 %137 }
 0x201   :  { %v140_v20 = vadd.f32 %v138_v19, %v130_v18 }
 0x203   :  { %v829_v21 = vmul.f32 -2.0, %v140_v20 }
 0x205   :  { %v143_v22 = vmul.f32 1.442695, %v829_v21 }
 0x207   :  { %988 = vpow2.f32 %v143_v22 }
 0x214   :  { %v989_v23 = vpop.eup %988 }
 0x215   :  { %v145_v24 = vadd.f32 1.0, %v989_v23 }
 0x217   :  { %990 = vrcp.f32 %v145_v24 }
 0x224   :  { %v991_v25 = vpop.eup %990 }
 0x225   :  { %v148_v26 = vmul.f32 2.0, %v991_v25 }
 0x227   :  { %v830_v27 = vadd.f32 -1.0, %v148_v26 }
 0x229   :  { %151 = vrot.lane.b32.xlu1 %v830_v27, %s1135_s18  ;;  %v322_v27 = vld [vmem:[#allocation2 + $0x6] sm:$0x3] }
 0x29b   :  { %v152_v28 = vpop.permute.xlu1 %151 }
 0x29c   :  { %v154_v29 = vmul.f32 %v987_v13, %v152_v28 }
 0x29e   :  { %v157_v30 = vpack.c.bf16 %v154_v29, %v154_v29 }
 0x2a0   :  { %159 = vrot.lane.b32.xlu1 %v157_v30, %s1138_s25 }
 0x312   :  { %v160_v31 = vpop.permute.xlu1 %159 }
 0x313   :  { %910 = vmatmul.mubr.msk.bf16.vlgmr.msra.gmra.mxu1 %vm77_vm1, %v160_v31 }
 0x314   :  { %922 = vmatpush3.bf16.msra.mxu1 %v1191_v1  ;;  %925 = vmatprep.mubr.msk.bf16.mxu1 %vm1142_vm0, %v1141_v0 }
 0x315   :  { %923 = vmatprep.subr.bf16.mxu1 %v1141_v0 }
 0x318   :  { %924 = vmatpush3.bf16.msra.mxu1 %v1194_v2 }
 0x319   :  { %937 = vmatprep.subr.bf16.mxu1 %v1141_v0 }
 0x3d3   :  { %v198_v33 = vpop.f32.mrf.mxu1 }
 0x3d4   :  { %v204_v34 = vadd.f32 %v198_v33, %v156_v32 }
 0x3d5   :  { %v911_v35 = vpop.f32.mrf.mxu1 }
 0x3d6   :  { %v832_v36 = vmul.f32 -1.442695, %v204_v34 }
 0x3d7   :  { %v201_v37 = vpop.f32.mrf.mxu1 }
 0x3d8   :  { %992 = vpow2.f32 %v832_v36 }
 0x3d9   :  { %v912_v38 = vpop.f32.mrf.mxu1 }
 0x3e5   :  { %v993_v39 = vpop.eup %992 }
 0x3e6   :  { %v208_v40 = vadd.f32 1.0, %v993_v39 }
 0x3e8   :  { %994 = vrcp.f32 %v208_v40 }
 0x3f5   :  { %v995_v41 = vpop.eup %994 }
 0x3f6   :  { %v211_v42 = vmul.f32 2.0, %v995_v41  ;;  %v213_v46 = vmul.f32 %v995_v41, %v140_v20 }
 0x3f8   :  { %v833_v43 = vadd.f32 -1.0, %v211_v42 }
 0x3fa   :  { %215 = vrot.lane.b32.xlu0 %v833_v43, %s1135_s18 }
 0x46c   :  { %v216_v44 = vpop.permute.xlu0 %215 }
 0x46d   :  { %v218_v45 = vmul.f32 %v995_v41, %v216_v44 }
 0x46f   :  { %220 = vrot.lane.b32.xlu1 %v218_v45, %s1138_s25 }
 0x4e1   :  { %v221_v47 = vpop.permute.xlu1 %220 }
 0x4e2   :  { %v223_v48 = vadd.f32 %v221_v47, %v213_v46 }
 0x4e4   :  { %v834_v49 = vmul.f32 -2.0, %v223_v48 }
 0x4e6   :  { %v226_v50 = vmul.f32 1.442695, %v834_v49 }
 0x4e8   :  { %996 = vpow2.f32 %v226_v50 }
 0x4f5   :  { %v997_v51 = vpop.eup %996 }
 0x4f6   :  { %v228_v52 = vadd.f32 1.0, %v997_v51 }
 0x4f8   :  { %998 = vrcp.f32 %v228_v52 }
 0x505   :  { %v999_v53 = vpop.eup %998 }
 0x506   :  { %v231_v54 = vmul.f32 2.0, %v999_v53 }
 0x508   :  { %v835_v55 = vadd.f32 -1.0, %v231_v54 }
 0x50a   :  { %234 = vrot.lane.b32.xlu0 %v835_v55, %s1135_s18  ;;  %v405_v55 = vld [vmem:[#allocation2 + $0x8] sm:$0x3] }
 0x57c   :  { %v235_v56 = vpop.permute.xlu0 %234 }
 0x57d   :  { %v237_v57 = vmul.f32 %v995_v41, %v235_v56 }
 0x57f   :  { %v240_v58 = vpack.c.bf16 %v237_v57, %v237_v57 }
 0x581   :  { %242 = vrot.lane.b32.xlu1 %v240_v58, %s1138_s25 }
 0x5f3   :  { %v243_v59 = vpop.permute.xlu1 %242 }
 0x5f4   :  { %918 = vmatmul.mubr.msk.bf16.vlgmr.msra.gmra.mxu0 %vm77_vm1, %v243_v59 }
 0x5f5   :  { %930 = vmatpush3.bf16.msra.mxu0 %v1191_v1  ;;  %933 = vmatprep.mubr.msk.bf16.mxu0 %vm1142_vm0, %v1141_v0 }
 0x5f6   :  { %931 = vmatprep.subr.bf16.mxu0 %v1141_v0 }
 0x5f9   :  { %932 = vmatpush3.bf16.msra.mxu0 %v1194_v2 }
 0x5fa   :  { %945 = vmatprep.subr.bf16.mxu0 %v1141_v0 }
 0x6b4   :  { %v281_v61 = vpop.f32.mrf.mxu0 }
 0x6b5   :  { %v287_v62 = vadd.f32 %v281_v61, %v239_v60 }
 0x6b6   :  { %v919_v63 = vpop.f32.mrf.mxu0 }
 0x6b7   :  { %v837_v3 = vmul.f32 -1.442695, %v287_v62 }
 0x6b8   :  { %v284_v4 = vpop.f32.mrf.mxu0 }
 0x6b9   :  { %1000 = vpow2.f32 %v837_v3 }
 0x6ba   :  { %v920_v5 = vpop.f32.mrf.mxu0 }
 0x6c6   :  { %v1001_v6 = vpop.eup %1000 }
 0x6c7   :  { %v291_v7 = vadd.f32 1.0, %v1001_v6 }
 0x6c9   :  { %1002 = vrcp.f32 %v291_v7 }
 0x6d6   :  { %v1003_v8 = vpop.eup %1002 }
 0x6d7   :  { %v294_v9 = vmul.f32 2.0, %v1003_v8  ;;  %v296_v13 = vmul.f32 %v1003_v8, %v223_v48 }
 0x6d9   :  { %v838_v10 = vadd.f32 -1.0, %v294_v9 }
 0x6db   :  { %298 = vrot.lane.b32.xlu0 %v838_v10, %s1135_s18 }
 0x74d   :  { %v299_v11 = vpop.permute.xlu0 %298 }
 0x74e   :  { %v301_v12 = vmul.f32 %v1003_v8, %v299_v11 }
 0x750   :  { %303 = vrot.lane.b32.xlu1 %v301_v12, %s1138_s25 }
 0x7c2   :  { %v304_v14 = vpop.permute.xlu1 %303 }
 0x7c3   :  { %v306_v15 = vadd.f32 %v304_v14, %v296_v13 }
 0x7c5   :  { %v839_v16 = vmul.f32 -2.0, %v306_v15 }
 0x7c7   :  { %v309_v17 = vmul.f32 1.442695, %v839_v16 }
 0x7c9   :  { %1004 = vpow2.f32 %v309_v17 }
 0x7d6   :  { %v1005_v18 = vpop.eup %1004 }
 0x7d7   :  { %v311_v19 = vadd.f32 1.0, %v1005_v18 }
 0x7d9   :  { %1006 = vrcp.f32 %v311_v19 }
 0x7e6   :  { %v1007_v20 = vpop.eup %1006 }
 0x7e7   :  { %v314_v21 = vmul.f32 2.0, %v1007_v20 }
 0x7e9   :  { %v840_v22 = vadd.f32 -1.0, %v314_v21 }
 0x7eb   :  { %317 = vrot.lane.b32.xlu0 %v840_v22, %s1135_s18  ;;  %v488_v22 = vld [vmem:[#allocation2 + $0xa] sm:$0x3] }
 0x85d   :  { %v318_v23 = vpop.permute.xlu0 %317 }
 0x85e   :  { %v320_v24 = vmul.f32 %v1003_v8, %v318_v23 }
 0x860   :  { %v323_v25 = vpack.c.bf16 %v320_v24, %v320_v24 }
 0x862   :  { %325 = vrot.lane.b32.xlu1 %v323_v25, %s1138_s25 }
 0x8d4   :  { %v326_v26 = vpop.permute.xlu1 %325 }
 0x8d5   :  { %926 = vmatmul.mubr.msk.bf16.vlgmr.msra.gmra.mxu1 %vm77_vm1, %v326_v26 }
 0x8d6   :  { %938 = vmatpush3.bf16.msra.mxu1 %v1191_v1  ;;  %941 = vmatprep.mubr.msk.bf16.mxu1 %vm1142_vm0, %v1141_v0 }
 0x8d7   :  { %939 = vmatprep.subr.bf16.mxu1 %v1141_v0 }
 0x8da   :  { %940 = vmatpush3.bf16.msra.mxu1 %v1194_v2 }
 0x8db   :  { %953 = vmatprep.subr.bf16.mxu1 %v1141_v0 }
 0x995   :  { %v364_v28 = vpop.f32.mrf.mxu1 }
 0x996   :  { %v370_v29 = vadd.f32 %v364_v28, %v322_v27 }
 0x997   :  { %v927_v30 = vpop.f32.mrf.mxu1 }
 0x998   :  { %v842_v31 = vmul.f32 -1.442695, %v370_v29 }
 0x999   :  { %v367_v32 = vpop.f32.mrf.mxu1 }
 0x99a   :  { %1008 = vpow2.f32 %v842_v31 }
 0x99b   :  { %v928_v33 = vpop.f32.mrf.mxu1 }
 0x9a7   :  { %v1009_v34 = vpop.eup %1008 }
 0x9a8   :  { %v374_v35 = vadd.f32 1.0, %v1009_v34 }
 0x9aa   :  { %1010 = vrcp.f32 %v374_v35 }
 0x9b7   :  { %v1011_v36 = vpop.eup %1010 }
 0x9b8   :  { %v377_v37 = vmul.f32 2.0, %v1011_v36  ;;  %v379_v41 = vmul.f32 %v1011_v36, %v306_v15 }
 0x9ba   :  { %v843_v38 = vadd.f32 -1.0, %v377_v37 }
 0x9bc   :  { %381 = vrot.lane.b32.xlu0 %v843_v38, %s1135_s18 }
 0xa2e   :  { %v382_v39 = vpop.permute.xlu0 %381 }
 0xa2f   :  { %v384_v40 = vmul.f32 %v1011_v36, %v382_v39 }
 0xa31   :  { %386 = vrot.lane.b32.xlu1 %v384_v40, %s1138_s25 }
 0xaa3   :  { %v387_v42 = vpop.permute.xlu1 %386 }
 0xaa4   :  { %v389_v43 = vadd.f32 %v387_v42, %v379_v41 }
 0xaa6   :  { %v844_v44 = vmul.f32 -2.0, %v389_v43 }
 0xaa8   :  { %v392_v45 = vmul.f32 1.442695, %v844_v44 }
 0xaaa   :  { %1012 = vpow2.f32 %v392_v45 }
 0xab7   :  { %v1013_v46 = vpop.eup %1012 }
 0xab8   :  { %v394_v47 = vadd.f32 1.0, %v1013_v46 }
 0xaba   :  { %1014 = vrcp.f32 %v394_v47 }
 0xac7   :  { %v1015_v48 = vpop.eup %1014 }
 0xac8   :  { %v397_v49 = vmul.f32 2.0, %v1015_v48  ;;  %v571_v48 = vld [vmem:[#allocation2 + $0xc] sm:$0x3] }
 0xaca   :  { %v845_v50 = vadd.f32 -1.0, %v397_v49 }
 0xacc   :  { %400 = vrot.lane.b32.xlu0 %v845_v50, %s1135_s18 }
 0xb3e   :  { %v401_v51 = vpop.permute.xlu0 %400 }
 0xb3f   :  { %v403_v52 = vmul.f32 %v1011_v36, %v401_v51 }
 0xb41   :  { %v406_v53 = vpack.c.bf16 %v403_v52, %v403_v52 }
 0xb43   :  { %408 = vrot.lane.b32.xlu1 %v406_v53, %s1138_s25 }
 0xbb5   :  { %v409_v54 = vpop.permute.xlu1 %408 }
 0xbb6   :  { %934 = vmatmul.mubr.msk.bf16.vlgmr.msra.gmra.mxu0 %vm77_vm1, %v409_v54 }
 0xbb7   :  { %946 = vmatpush3.bf16.msra.mxu0 %v1191_v1  ;;  %949 = vmatprep.mubr.msk.bf16.mxu0 %vm1142_vm0, %v1141_v0 }
 0xbb8   :  { %947 = vmatprep.subr.bf16.mxu0 %v1141_v0 }
 0xbbb   :  { %948 = vmatpush3.bf16.msra.mxu0 %v1194_v2 }
 0xbbc   :  { %961 = vmatprep.subr.bf16.mxu0 %v1141_v0 }
 0xc76   :  { %v447_v56 = vpop.f32.mrf.mxu0 }
 0xc77   :  { %v453_v57 = vadd.f32 %v447_v56, %v405_v55 }
 0xc78   :  { %v935_v58 = vpop.f32.mrf.mxu0 }
 0xc79   :  { %v847_v59 = vmul.f32 -1.442695, %v453_v57 }
 0xc7a   :  { %v450_v60 = vpop.f32.mrf.mxu0 }
 0xc7b   :  { %1016 = vpow2.f32 %v847_v59 }
 0xc7c   :  { %v936_v61 = vpop.f32.mrf.mxu0 }
 0xc88   :  { %v1017_v62 = vpop.eup %1016 }
 0xc89   :  { %v457_v63 = vadd.f32 1.0, %v1017_v62 }
 0xc8b   :  { %1018 = vrcp.f32 %v457_v63 }
 0xc98   :  { %v1019_v3 = vpop.eup %1018 }
 0xc99   :  { %v460_v4 = vmul.f32 2.0, %v1019_v3  ;;  %v462_v8 = vmul.f32 %v1019_v3, %v389_v43 }
 0xc9b   :  { %v848_v5 = vadd.f32 -1.0, %v460_v4 }
 0xc9d   :  { %464 = vrot.lane.b32.xlu0 %v848_v5, %s1135_s18 }
 0xd0f   :  { %v465_v6 = vpop.permute.xlu0 %464 }
 0xd10   :  { %v467_v7 = vmul.f32 %v1019_v3, %v465_v6 }
 0xd12   :  { %469 = vrot.lane.b32.xlu1 %v467_v7, %s1138_s25 }
 0xd84   :  { %v470_v9 = vpop.permute.xlu1 %469 }
 0xd85   :  { %v472_v10 = vadd.f32 %v470_v9, %v462_v8 }
 0xd87   :  { %v849_v11 = vmul.f32 -2.0, %v472_v10 }
 0xd89   :  { %v475_v12 = vmul.f32 1.442695, %v849_v11 }
 0xd8b   :  { %1020 = vpow2.f32 %v475_v12 }
 0xd98   :  { %v1021_v13 = vpop.eup %1020 }
 0xd99   :  { %v477_v14 = vadd.f32 1.0, %v1021_v13 }
 0xd9b   :  { %1022 = vrcp.f32 %v477_v14 }
 0xda8   :  { %v1023_v15 = vpop.eup %1022 }
 0xda9   :  { %v480_v16 = vmul.f32 2.0, %v1023_v15  ;;  %v654_v15 = vld [vmem:[#allocation2 + $0xe] sm:$0x3] }
 0xdab   :  { %v850_v17 = vadd.f32 -1.0, %v480_v16 }
 0xdad   :  { %483 = vrot.lane.b32.xlu0 %v850_v17, %s1135_s18 }
 0xe1f   :  { %v484_v18 = vpop.permute.xlu0 %483 }
 0xe20   :  { %v486_v19 = vmul.f32 %v1019_v3, %v484_v18 }
 0xe22   :  { %v489_v20 = vpack.c.bf16 %v486_v19, %v486_v19 }
 0xe24   :  { %491 = vrot.lane.b32.xlu1 %v489_v20, %s1138_s25 }
 0xe96   :  { %v492_v21 = vpop.permute.xlu1 %491 }
 0xe97   :  { %942 = vmatmul.mubr.msk.bf16.vlgmr.msra.gmra.mxu1 %vm77_vm1, %v492_v21 }
 0xe98   :  { %954 = vmatpush3.bf16.msra.mxu1 %v1191_v1  ;;  %957 = vmatprep.mubr.msk.bf16.mxu1 %vm1142_vm0, %v1141_v0 }
 0xe99   :  { %955 = vmatprep.subr.bf16.mxu1 %v1141_v0 }
 0xe9c   :  { %956 = vmatpush3.bf16.msra.mxu1 %v1194_v2 }
 0xf57   :  { %v530_v23 = vpop.f32.mrf.mxu1 }
 0xf58   :  { %v536_v24 = vadd.f32 %v530_v23, %v488_v22 }
 0xf59   :  { %v943_v25 = vpop.f32.mrf.mxu1 }
 0xf5a   :  { %v852_v26 = vmul.f32 -1.442695, %v536_v24 }
 0xf5b   :  { %v533_v27 = vpop.f32.mrf.mxu1 }
 0xf5c   :  { %1024 = vpow2.f32 %v852_v26 }
 0xf5d   :  { %v944_v28 = vpop.f32.mrf.mxu1 }
 0xf69   :  { %v1025_v29 = vpop.eup %1024 }
 0xf6a   :  { %v540_v30 = vadd.f32 1.0, %v1025_v29 }
 0xf6c   :  { %1026 = vrcp.f32 %v540_v30 }
 0xf79   :  { %v1027_v31 = vpop.eup %1026 }
 0xf7a   :  { %v543_v1 = vmul.f32 2.0, %v1027_v31  ;;  %v545_v2 = vmul.f32 %v1027_v31, %v472_v10 }
 0xf7c   :  { %v853_v32 = vadd.f32 -1.0, %v543_v1 }
 0xf7e   :  { %547 = vrot.lane.b32.xlu0 %v853_v32, %s1135_s18 }
 0xff0   :  { %v548_v33 = vpop.permute.xlu0 %547 }
 0xff1   :  { %v550_v34 = vmul.f32 %v1027_v31, %v548_v33 }
 0xff3   :  { %552 = vrot.lane.b32.xlu1 %v550_v34, %s1138_s25 }
0x1065   :  { %v553_v35 = vpop.permute.xlu1 %552 }
0x1066   :  { %v555_v36 = vadd.f32 %v553_v35, %v545_v2  ;;  %v982_v2 = vld [vmem:[#allocation7 + $0x8] sm:$0xff]  }
0x1068   :  { %v854_v37 = vmul.f32 -2.0, %v555_v36 }
0x106a   :  { %v558_v38 = vmul.f32 1.442695, %v854_v37 }
0x106c   :  { %1028 = vpow2.f32 %v558_v38 }
0x1079   :  { %v1029_v39 = vpop.eup %1028 }
0x107a   :  { %v560_v40 = vadd.f32 1.0, %v1029_v39 }
0x107c   :  { %1030 = vrcp.f32 %v560_v40 }
0x1089   :  { %v1031_v41 = vpop.eup %1030 }
0x108a   :  { %v563_v42 = vmul.f32 2.0, %v1031_v41 }
0x108c   :  { %v855_v43 = vadd.f32 -1.0, %v563_v42 }
0x108e   :  { %566 = vrot.lane.b32.xlu0 %v855_v43, %s1135_s18 }
0x1100   :  { %v567_v44 = vpop.permute.xlu0 %566 }
0x1101   :  { %v569_v45 = vmul.f32 %v1027_v31, %v567_v44  ;;  %v866_v44 = vld [vmem:[%s1290_s3] ss:$0 sm:$0xff] }
0x1103   :  { %v572_v46 = vpack.c.bf16 %v569_v45, %v569_v45 }
0x1105   :  { %574 = vrot.lane.b32.xlu1 %v572_v46, %s1138_s25 }
0x1177   :  { %v575_v47 = vpop.permute.xlu1 %574 }
0x1178   :  { %950 = vmatmul.mubr.msk.bf16.vlgmr.msra.gmra.mxu0 %vm77_vm1, %v575_v47 }
0x1179   :  { %965 = vmatprep.mubr.msk.bf16.mxu0 %vm1142_vm0, %v1141_v0  ;;  %962 = vmatpush3.bf16.msra.mxu0 %v982_v2 }
0x117a   :  { %963 = vmatprep.subr.bf16.mxu0 %v1141_v0 }
0x1238   :  { %v613_v49 = vpop.f32.mrf.mxu0 }
0x1239   :  { %v619_v50 = vadd.f32 %v613_v49, %v571_v48 }
0x123a   :  { %v951_v51 = vpop.f32.mrf.mxu0 }
0x123b   :  { %v857_v52 = vmul.f32 -1.442695, %v619_v50 }
0x123c   :  { %v616_v53 = vpop.f32.mrf.mxu0 }
0x123d   :  { %1032 = vpow2.f32 %v857_v52 }
0x123e   :  { %v952_v54 = vpop.f32.mrf.mxu0 }
0x124a   :  { %v1033_v55 = vpop.eup %1032 }
0x124b   :  { %v623_v56 = vadd.f32 1.0, %v1033_v55 }
0x124d   :  { %1034 = vrcp.f32 %v623_v56 }
0x125a   :  { %v1035_v57 = vpop.eup %1034 }
0x125b   :  { %v626_v58 = vmul.f32 2.0, %v1035_v57  ;;  %v628_v62 = vmul.f32 %v1035_v57, %v555_v36  ;;  %v983_v36 = vld [vmem:[#allocation7] sm:$0xff]  }
0x125c   :  { %964 = vmatpush3.bf16.msra.mxu0 %v983_v36 }
0x125d   :  { %v858_v59 = vadd.f32 -1.0, %v626_v58 }
0x125f   :  { %630 = vrot.lane.b32.xlu0 %v858_v59, %s1135_s18 }
0x12d1   :  { %v631_v60 = vpop.permute.xlu0 %630 }
0x12d2   :  { %v633_v61 = vmul.f32 %v1035_v57, %v631_v60 }
0x12d4   :  { %635 = vrot.lane.b32.xlu1 %v633_v61, %s1138_s25 }
0x1346   :  { %v636_v63 = vpop.permute.xlu1 %635 }
0x1347   :  { %v638_v3 = vadd.f32 %v636_v63, %v628_v62 }
0x1349   :  { %v859_v4 = vmul.f32 -2.0, %v638_v3 }
0x134b   :  { %v641_v5 = vmul.f32 1.442695, %v859_v4 }
0x134d   :  { %1036 = vpow2.f32 %v641_v5 }
0x135a   :  { %v1037_v6 = vpop.eup %1036 }
0x135b   :  { %v643_v7 = vadd.f32 1.0, %v1037_v6 }
0x135d   :  { %1038 = vrcp.f32 %v643_v7 }
0x136a   :  { %v1039_v8 = vpop.eup %1038 }
0x136b   :  { %v646_v9 = vmul.f32 2.0, %v1039_v8 }
0x136d   :  { %v860_v10 = vadd.f32 -1.0, %v646_v9 }
0x136f   :  { %649 = vrot.lane.b32.xlu0 %v860_v10, %s1135_s18 }
0x13e1   :  { %v650_v11 = vpop.permute.xlu0 %649 }
0x13e2   :  { %v652_v12 = vmul.f32 %v1035_v57, %v650_v11 }
0x13e4   :  { %v655_v13 = vpack.c.bf16 %v652_v12, %v652_v12 }
0x13e6   :  { %657 = vrot.lane.b32.xlu1 %v655_v13, %s1138_s25 }
0x1458   :  { %v658_v14 = vpop.permute.xlu1 %657 }
0x1459   :  { %958 = vmatmul.mubr.msk.bf16.vlgmr.msra.gmra.mxu1 %vm77_vm1, %v658_v14 }
0x1519   :  { %v696_v16 = vpop.f32.mrf.mxu1 }
0x151a   :  { %v702_v17 = vadd.f32 %v696_v16, %v654_v15 }
0x151b   :  { %v959_v18 = vpop.f32.mrf.mxu1 }
0x151c   :  { %v862_v19 = vmul.f32 -1.442695, %v702_v17 }
0x151d   :  { %v699_v20 = vpop.f32.mrf.mxu1 }
0x151e   :  { %1040 = vpow2.f32 %v862_v19 }
0x151f   :  { %v960_v21 = vpop.f32.mrf.mxu1 }
0x152b   :  { %v1041_v22 = vpop.eup %1040 }
0x152c   :  { %v706_v23 = vadd.f32 1.0, %v1041_v22 }
0x152e   :  { %1042 = vrcp.f32 %v706_v23 }
0x153b   :  { %v1043_v24 = vpop.eup %1042 }
0x153c   :  { %v709_v25 = vmul.f32 2.0, %v1043_v24  ;;  %v711_v29 = vmul.f32 %v1043_v24, %v638_v3 }
0x153e   :  { %v863_v26 = vadd.f32 -1.0, %v709_v25 }
0x1540   :  { %713 = vrot.lane.b32.xlu0 %v863_v26, %s1135_s18 }
0x15b2   :  { %v714_v27 = vpop.permute.xlu0 %713 }
0x15b3   :  { %v716_v28 = vmul.f32 %v1043_v24, %v714_v27 }
0x15b5   :  { %718 = vrot.lane.b32.xlu1 %v716_v28, %s1138_s25 }
0x1627   :  { %v719_v30 = vpop.permute.xlu1 %718 }
0x1628   :  { %v721_v31 = vadd.f32 %v719_v30, %v711_v29 }
0x162a   :  { %v864_v1 = vmul.f32 -2.0, %v721_v31 }
0x162c   :  { %v724_v32 = vmul.f32 1.442695, %v864_v1 }
0x162e   :  { %1044 = vpow2.f32 %v724_v32 }
0x163b   :  { %v1045_v33 = vpop.eup %1044 }
0x163c   :  { %v726_v34 = vadd.f32 1.0, %v1045_v33 }
0x163e   :  { %1046 = vrcp.f32 %v726_v34 }
0x164b   :  { %v1047_v35 = vpop.eup %1046 }
0x164c   :  { %v729_v37 = vmul.f32 2.0, %v1047_v35 }
0x164e   :  { %v865_v38 = vadd.f32 -1.0, %v729_v37 }
0x1650   :  { %732 = vrot.lane.b32.xlu0 %v865_v38, %s1135_s18 }
0x16c2   :  { %v733_v39 = vpop.permute.xlu0 %732 }
0x16c3   :  { %v735_v40 = vmul.f32 %v1043_v24, %v733_v39 }
0x16c5   :  { %v736_v41 = vmax.f32 %v735_v40, 0.0 }
0x16c7   :  { %v737_v42 = vpack.c.bf16 %v736_v41, %v736_v41 }
0x16c9   :  { %750 = vrot.lane.b32.xlu1 %v737_v42, %s1138_s25 }
0x173b   :  { %v751_v43 = vpop.permute.xlu1 %750 }
0x173c   :  { %966 = vmatmul.mubr.msk.bf16.vlgmr.msra.gmra.mxu0 %vm77_vm1, %v751_v43 }
0x17fc   :  { %v801_v45 = vpop.f32.mrf.mxu0 }
0x17fd   :  { %v802_v0 = vadd.f32 %v866_v44, %v801_v45 }
0x17fe   :  { %v967_v46 = vpop.f32.mrf.mxu0 }
0x17ff   :  { %v807_v47 = vmax.f32 %v802_v0, 0.0 }
0x1800   :  { %v804_v48 = vpop.f32.mrf.mxu0 }
0x1801   :  { %808 = vst [vmem:[#allocation8] sm:$0x3] %v807_v47 }
0x1802   :  { %v968_v49 = vpop.f32.mrf.mxu0 }
0x1803   :  { %1119 = shalt.err (!%p1116_p5)
}
0x1804   :  { %818 = dma.vmem_to_hbm [thread:$0]  %s816_s8, 32, %s1291_s4, [#allocation4]  }
0x1805   :  { %1132 = dma.done.wait [#allocation4], 32  }
0x1806   :  { %1133 = vsyncadd [#allocation4], 4294967264 }
0x1807   :  { %822 = vsyncpa [#allocation3], 1 }
0x1808   :  { %823 = vsyncpa [#allocation6], 1 }
0x1809   :  { %824 = vsyncpa [#allocation4], 1 }

</bundles_post_ra>
